<compile_context>
chip_gen: v5e
topology: v5e:2x2
jax: 0.10.0
libtpu: 0.0.40
codegen_flags: <defaults>
</compile_context>

<pallas_src>
import math
import functools

import jax
import jax.numpy as jnp
from jax import lax
from jax.experimental import pallas as pl
from jax.experimental.pallas import tpu as pltpu

_EPS = 1e-12  # F.normalize eps


def _round_up(n, m):
    return ((n + m - 1) // m) * m


def _acm_kernel(x_ref, wt_ref, invx_ref, invw_ref, lab_ref, o_ref, *,
                scale_margin, training, tile_c):
    # MXU matmul: (TB, Dp) @ (Dp, TC), f32 accumulation.  Weight tile is already in its
    # natural (K, N) layout -> no in-kernel transpose / relayout before the MXU.
    dot = lax.dot_general(
        x_ref[...], wt_ref[...],
        dimension_numbers=(((1,), (0,)), ((), ())),
        preferred_element_type=jnp.float32)                          # (TB, TC) f32

    # Post-scale the small result tile instead of normalizing the big operands.
    # invx = 1/max(||x_row||, eps)   (TB, 1)
    # invw = scale/max(||w_row||, eps) (1, TC)  (scale folded in by the wrapper)
    scaled = dot * invx_ref[...] * invw_ref[...]

    if training:
        j = pl.program_id(1)
        # Apply the class-tile offset to the scalar side (TB,1), not the (TB,TC) iota.
        tgt = lab_ref[...] - j * tile_c                              # (TB, 1) int32
        col = lax.broadcasted_iota(jnp.int32, scaled.shape, 1)       # (TB, TC)
        out = jnp.where(col == tgt, scaled - scale_margin, scaled)   # fused margin epilogue
    else:
        out = scaled

    o_ref[...] = out.astype(o_ref.dtype)


def _pick_tile_b(B, Dp, tile_c, compute_itemsize, out_itemsize, budget_bytes):
    """Largest batch tile (ideally the whole padded batch) whose double-buffered
    VMEM footprint fits the budget -> the weight matrix streams from HBM once."""
    full = _round_up(B, 8)
    candidates = [full] + [t for t in (4096, 2048, 1024, 512, 256, 128, 64, 32, 16, 8)
                           if t < full]
    for tb in candidates:
        est = (2 * tb * Dp * compute_itemsize           # x tile (double-buffered)
               + 2 * Dp * tile_c * compute_itemsize     # W tile
               + 2 * tb * tile_c * out_itemsize         # out tile
               + 4 * tb * tile_c * 4                    # f32 dot / where temporaries
               + 2 * 2 * tb * 128 * 4                   # inv_x + labels (lane-padded)
               + 2 * 8 * tile_c * 4)                    # inv_w (sublane-padded)
        if est <= budget_bytes:
            return tb
    return 8


def additive_cosine_margin_linear(x, weight, label, *, scale=30.0, margin=0.35,
                                  training=True, tile_b=None, tile_c=512,
                                  compute_dtype=jnp.bfloat16, out_dtype=jnp.float32,
                                  vmem_limit_bytes=48 * 1024 * 1024):
    """CosFace / additive-cosine-margin linear forward.

    x:      (B, in_features) float
    weight: (out_features, in_features) float
    label:  (B,) integer class indices (used only when training=True)
    returns (B, out_features) out_dtype (default float32)
    """
    B, D = x.shape
    C, D2 = weight.shape
    assert D == D2, "in_features mismatch"
    scale = float(scale)
    margin = float(margin)

    # --- Hoisted normalization factors, computed ONCE in f32 on the original values ---
    x32 = x.astype(jnp.float32)
    inv_x = lax.rsqrt(jnp.maximum(jnp.sum(x32 * x32, axis=1, keepdims=True),
                                  _EPS * _EPS))                      # (B, 1)
    w32 = weight.astype(jnp.float32)
    inv_w = lax.rsqrt(jnp.maximum(jnp.sum(w32 * w32, axis=1), _EPS * _EPS))
    inv_w = (inv_w * scale).reshape(1, C).astype(jnp.float32)        # scale folded in

    # --- Tile / padding geometry (lane-dense everywhere) ---
    Dp = _round_up(D, 128)
    tile_c = int(min(tile_c, _round_up(C, 128)))
    Cp = _round_up(C, tile_c)

    compute_itemsize = jnp.dtype(compute_dtype).itemsize
    out_itemsize = jnp.dtype(out_dtype).itemsize
    if tile_b is None:
        budget = int(0.6 * (vmem_limit_bytes or (32 * 1024 * 1024)))
        tile_b = _pick_tile_b(B, Dp, tile_c, compute_itemsize, out_itemsize, budget)
    tile_b = int(min(_round_up(tile_b, 8), _round_up(B, 8)))
    Bp = _round_up(B, tile_b)

    # --- Operand prep (zero padding does not change norms or dot products) ---
    xp = x.astype(compute_dtype)
    if (Bp, Dp) != (B, D):
        xp = jnp.pad(xp, ((0, Bp - B), (0, Dp - D)))
    # Pre-transposed weights: (Dp, Cp) so the kernel matmul is (TB,Dp)@(Dp,TC).
    wp = weight.astype(compute_dtype)
    if (Cp, Dp) != (C, D):
        wp = jnp.pad(wp, ((0, Cp - C), (0, Dp - D)))
    wt = wp.T
    inv_xp = inv_x if Bp == B else jnp.pad(inv_x, ((0, Bp - B), (0, 0)))
    # Padded class columns get inv_w == 0 (and zero weight rows) -> output exactly 0 there.
    inv_wp = inv_w if Cp == C else jnp.pad(inv_w, ((0, 0), (0, Cp - C)))
    lab = jnp.asarray(label).reshape(-1, 1).astype(jnp.int32)
    if Bp != B:
        lab = jnp.pad(lab, ((0, Bp - B), (0, 0)), constant_values=-1)

    grid = (Bp // tile_b, Cp // tile_c)

    kernel = functools.partial(
        _acm_kernel, scale_margin=scale * margin,
        training=bool(training), tile_c=tile_c)

    cost = pl.CostEstimate(
        flops=2 * Bp * Cp * Dp,
        transcendentals=0,
        bytes_accessed=int(xp.size * compute_itemsize * grid[1]
                           + wt.size * compute_itemsize * grid[0]
                           + inv_xp.size * 4 + inv_wp.size * 4 + lab.size * 4
                           + Bp * Cp * out_itemsize))

    out = pl.pallas_call(
        kernel,
        out_shape=jax.ShapeDtypeStruct((Bp, Cp), out_dtype),
        grid=grid,
        in_specs=[
            pl.BlockSpec((tile_b, Dp), lambda i, j: (i, 0)),         # x tile
            pl.BlockSpec((Dp, tile_c), lambda i, j: (0, j)),         # W^T tile (K, N)
            pl.BlockSpec((tile_b, 1), lambda i, j: (i, 0)),          # 1/||x|| tile
            pl.BlockSpec((1, tile_c), lambda i, j: (0, j)),          # scale/||w|| tile
            pl.BlockSpec((tile_b, 1), lambda i, j: (i, 0)),          # label tile
        ],
        out_specs=pl.BlockSpec((tile_b, tile_c), lambda i, j: (i, j)),
        compiler_params=pltpu.CompilerParams(
            # Class axis is "parallel": megacore / v7x 2-TC split classes (each core reads
            # half of W); batch axis "arbitrary" so W is never re-streamed per core.
            dimension_semantics=("arbitrary", "parallel"),
            vmem_limit_bytes=vmem_limit_bytes),
        cost_estimate=cost,
    )(xp, wt, inv_xp, inv_wp, lab)

    if (Bp, Cp) != (B, C):
        out = out[:B, :C]
    return out


def _reference(x, weight, label, scale, margin, training=True):
    xn = x / jnp.maximum(jnp.linalg.norm(x, axis=1, keepdims=True), _EPS)
    wn = weight / jnp.maximum(jnp.linalg.norm(weight, axis=1, keepdims=True), _EPS)
    cos = xn @ wn.T
    if training:
        one_hot = jax.nn.one_hot(label, weight.shape[0], dtype=cos.dtype)
        return scale * (cos - one_hot * margin)
    return scale * cos


if __name__ == "__main__":
    scale, margin = 30.0, 0.35
    key = jax.random.PRNGKey(0)

    # --- case 1: small shapes (single tile; D and C padded up to lane width) ---
    B, Din, Dout = 8, 32, 16
    k1, k2, k3, key = jax.random.split(key, 4)
    x = jax.random.normal(k1, (B, Din), dtype=jnp.float32)
    # kaiming_uniform_(a=sqrt(5)) on (out, in): bound = 1/sqrt(fan_in)
    bound = 1.0 / math.sqrt(Din)
    w = jax.random.uniform(k2, (Dout, Din), dtype=jnp.float32, minval=-bound, maxval=bound)
    lab = jax.random.randint(k3, (B,), 0, Dout, dtype=jnp.int32)

    ref = _reference(x, w, lab, scale, margin, training=True)

    out_f32 = jax.block_until_ready(
        additive_cosine_margin_linear(x, w, lab, scale=scale, margin=margin,
                                      training=True, compute_dtype=jnp.float32))
    assert out_f32.shape == (B, Dout)
    assert jnp.allclose(out_f32, ref, atol=2e-4, rtol=2e-4), "case1 f32 mismatch"

    # Default fast path: bf16 MXU operands, f32 accumulation, f32 norm factors.
    out_bf16 = jax.block_until_ready(
        additive_cosine_margin_linear(x, w, lab, scale=scale, margin=margin,
                                      training=True, compute_dtype=jnp.bfloat16))
    # Relative check scaled by `scale` (logits live in [-scale-s*m, scale]).
    assert float(jnp.max(jnp.abs(out_bf16 - ref))) <= 0.02 * scale, "case1 bf16 mismatch"

    # Eval path (no margin).
    out_eval = jax.block_until_ready(
        additive_cosine_margin_linear(x, w, lab, scale=scale, margin=margin,
                                      training=False, compute_dtype=jnp.float32))
    ref_eval = _reference(x, w, lab, scale, margin, training=False)
    assert jnp.allclose(out_eval, ref_eval, atol=2e-4, rtol=2e-4), "case1 eval mismatch"

    # --- case 2: multi-tile grid with ragged B, C and non-128 D (exercises tiling,
    #             padding, per-tile label offsets, and the (i, j) index maps) ---
    B2, Din2, Dout2 = 40, 96, 272
    k1, k2, k3, key = jax.random.split(key, 4)
    x2 = jax.random.normal(k1, (B2, Din2), dtype=jnp.float32)
    bound2 = 1.0 / math.sqrt(Din2)
    w2 = jax.random.uniform(k2, (Dout2, Din2), dtype=jnp.float32,
                            minval=-bound2, maxval=bound2)
    lab2 = jax.random.randint(k3, (B2,), 0, Dout2, dtype=jnp.int32)

    out2 = jax.block_until_ready(
        additive_cosine_margin_linear(x2, w2, lab2, scale=scale, margin=margin,
                                      training=True, compute_dtype=jnp.float32,
                                      tile_b=16, tile_c=128))
    ref2 = _reference(x2, w2, lab2, scale, margin, training=True)
    assert out2.shape == (B2, Dout2)
    assert jnp.allclose(out2, ref2, atol=2e-4, rtol=2e-4), "case2 f32 mismatch"

    # --- case 3: auto tile_b (full-batch-resident), bf16 fast path, bf16 output ---
    out3 = jax.block_until_ready(
        additive_cosine_margin_linear(x2, w2, lab2, scale=scale, margin=margin,
                                      training=True, compute_dtype=jnp.bfloat16,
                                      out_dtype=jnp.bfloat16))
    assert out3.shape == (B2, Dout2) and out3.dtype == jnp.bfloat16
    assert float(jnp.max(jnp.abs(out3.astype(jnp.float32) - ref2))) <= 0.02 * scale, \
        "case3 bf16 mismatch"

    print("KERNEL_OK")
</pallas_src>

<mosaic_0001>
module attributes {stable_mosaic.version = 11 : i64} {
  func.func @_acm_kernel(%arg0: i32, %arg1: i32, %arg2: memref<8x128xf32, #tpu.memory_space<vmem>>, %arg3: memref<128x128xf32, #tpu.memory_space<vmem>>, %arg4: memref<8x1xf32, #tpu.memory_space<vmem>>, %arg5: memref<1x128xf32, #tpu.memory_space<vmem>>, %arg6: memref<8x1xi32, #tpu.memory_space<vmem>>, %arg7: memref<8x128xf32, #tpu.memory_space<vmem>>) attributes {dimension_semantics = [#tpu.dimension_semantics<arbitrary>, #tpu.dimension_semantics<parallel>], iteration_bounds = array<i64: 1, 1>, scalar_prefetch = 0 : i64, scratch_operands = 0 : i64, tpu.core_type = #tpu.core_type<tc>, window_params = [{transform_indices = @transform_0, window_bounds = array<i64: 8, 128>}, {transform_indices = @transform_1, window_bounds = array<i64: 128, 128>}, {transform_indices = @transform_2, window_bounds = array<i64: 8, 1>}, {transform_indices = @transform_3, window_bounds = array<i64: 1, 128>}, {transform_indices = @transform_4, window_bounds = array<i64: 8, 1>}, {transform_indices = @transform_5, window_bounds = array<i64: 8, 128>}]} {
    %c0 = arith.constant 0 : index
    %c0_0 = arith.constant 0 : index
    %0 = vector.load %arg2[%c0, %c0_0] : memref<8x128xf32, #tpu.memory_space<vmem>>, vector<8x128xf32>
    %c0_1 = arith.constant 0 : index
    %c0_2 = arith.constant 0 : index
    %1 = vector.load %arg3[%c0_1, %c0_2] : memref<128x128xf32, #tpu.memory_space<vmem>>, vector<128x128xf32>
    %cst = arith.constant dense<0.000000e+00> : vector<8x128xf32>
    %2 = tpu.matmul %0, %1, %cst {dimension_numbers = #tpu.dot_dimension_numbers<[1], [0], [0], [1], [0, 0, 1, 1], [], []>} : vector<8x128xf32>, vector<128x128xf32>, vector<8x128xf32> -> vector<8x128xf32>
    %c0_3 = arith.constant 0 : index
    %c0_4 = arith.constant 0 : index
    %3 = vector.load %arg4[%c0_3, %c0_4] : memref<8x1xf32, #tpu.memory_space<vmem>>, vector<8x1xf32>
    %4 = vector.broadcast %3 : vector<8x1xf32> to vector<8x128xf32>
    %5 = arith.mulf %2, %4 : vector<8x128xf32>
    %c0_5 = arith.constant 0 : index
    %c0_6 = arith.constant 0 : index
    %6 = vector.load %arg5[%c0_5, %c0_6] : memref<1x128xf32, #tpu.memory_space<vmem>>, vector<1x128xf32>
    %7 = vector.broadcast %6 : vector<1x128xf32> to vector<8x128xf32>
    %8 = arith.mulf %5, %7 : vector<8x128xf32>
    %c0_7 = arith.constant 0 : index
    %c0_8 = arith.constant 0 : index
    %9 = vector.load %arg6[%c0_7, %c0_8] : memref<8x1xi32, #tpu.memory_space<vmem>>, vector<8x1xi32>
    %c128_i32 = arith.constant 128 : i32
    %10 = arith.muli %arg1, %c128_i32 : i32
    %11 = vector.broadcast %10 : i32 to vector<8x1xi32>
    %12 = arith.subi %9, %11 : vector<8x1xi32>
    %13 = tpu.iota {dimensions = array<i32: 1>} : vector<8x128xi32>
    %14 = vector.broadcast %12 : vector<8x1xi32> to vector<8x128xi32>
    %15 = arith.cmpi eq, %13, %14 : vector<8x128xi32>
    %cst_9 = arith.constant 1.050000e+01 : f32
    %16 = vector.broadcast %cst_9 : f32 to vector<8x128xf32>
    %17 = arith.subf %8, %16 : vector<8x128xf32>
    %18 = arith.select %15, %17, %8 : vector<8x128xi1>, vector<8x128xf32>
    %c0_10 = arith.constant 0 : index
    %c0_11 = arith.constant 0 : index
    %19 = vector.load %arg7[%c0_10, %c0_11] : memref<8x128xf32, #tpu.memory_space<vmem>>, vector<8x128xf32>
    tpu.vector_store %arg7[%c0_10, %c0_11], %18 {strides = array<i32>} : memref<8x128xf32, #tpu.memory_space<vmem>>, vector<8x128xf32>,
    return
  }
  func.func @transform_0(%arg0: i32, %arg1: i32) -> (i32, i32) {
    %c0_i32 = arith.constant 0 : i32
    %c0_i32_0 = arith.constant 0 : i32
    return %arg0, %c0_i32 : i32, i32
  }
  func.func @transform_1(%arg0: i32, %arg1: i32) -> (i32, i32) {
    %c0_i32 = arith.constant 0 : i32
    %c0_i32_0 = arith.constant 0 : i32
    return %c0_i32, %arg1 : i32, i32
  }
  func.func @transform_2(%arg0: i32, %arg1: i32) -> (i32, i32) {
    %c0_i32 = arith.constant 0 : i32
    %c0_i32_0 = arith.constant 0 : i32
    return %arg0, %c0_i32 : i32, i32
  }
  func.func @transform_3(%arg0: i32, %arg1: i32) -> (i32, i32) {
    %c0_i32 = arith.constant 0 : i32
    %c0_i32_0 = arith.constant 0 : i32
    return %c0_i32, %arg1 : i32, i32
  }
  func.func @transform_4(%arg0: i32, %arg1: i32) -> (i32, i32) {
    %c0_i32 = arith.constant 0 : i32
    %c0_i32_0 = arith.constant 0 : i32
    return %arg0, %c0_i32 : i32, i32
  }
  func.func @transform_5(%arg0: i32, %arg1: i32) -> (i32, i32) {
    %c0_i32 = arith.constant 0 : i32
    return %arg0, %arg1 : i32, i32
  }
}

</mosaic_0001>

<bundles_post_ra>
// kernel: tpu_custom_call.1
= control target key start
LH: loop header
LB: loop body
LE: loop exit
PB: predicated region body
PF: predicated region fallthrough
CT: control target
= control target key end

     0   :  { %10 = vsyncpa [#allocation3], 0  ;;  %s229_s0 = inlined_call_operand.vmem [shape: f32[8,128], index: 0, kind: input, shape index: {}]   ;;  %s230_s1 = inlined_call_operand.hbm [shape: f32[128,128], index: 1, kind: input, shape index: {}]   ;;  %s231_s2 = inlined_call_operand.vmem [shape: f32[8,1], index: 2, kind: input, shape index: {}]   ;;  %s232_s3 = inlined_call_operand.vmem [shape: f32[1,128], index: 3, kind: input, shape index: {}]   ;;  %s233_s4 = inlined_call_operand.vmem [shape: s32[8,1], index: 4, kind: input, shape index: {}]   ;;  %s234_s5 = inlined_call_operand.hbm [shape: f32[8,128], index: 5, kind: output, shape index: {}]  }
   0x1   :  { %11 = vsyncpa [#allocation4], 0  ;;  %s18_s20 = sshll.u32 %s230_s1, 4  ;;  %s176_s21 = smov [#allocation2]   ;;  %s19_s20 = int_to_ptr.hbm [resolvable:$true] %s18_s20 }
   0x2   :  { %s20_s22 = sshll.u32 %s176_s21, 4  ;;  %s177_s23 = smov 128   ;;  %s21_s22 = int_to_ptr.vmem [resolvable:$true] %s20_s22 }
   0x3   :  { %s178_s24 = smov 8  }
   0x4   :  { %26 = dma.hbm_to_vmem [thread:$0]  %s19_s20, 2048, %s21_s22, [#allocation3], %s177_s23, %s177_s23, %s178_s24  }
   0x5   :  { %172 = dma.done.wait [#allocation3], 2048  }
   0x6   :  { %173 = vsyncadd [#allocation3], 4294965248  ;;  %v179_v0 = vmov 0   ;;  %v53_v1 = vld [vmem:[#allocation2 + $0x78] sm:$0xff]  ;;  %v52_v2 = vld [vmem:[#allocation2 + $0x70] sm:$0xff]  ;;  %v90_v21 = vlaneseq  ;;  %s180_s30 = smov [#allocation5]  }
   0x7   :  { %122 = vset.pattern.permute.xlu0 %v179_v0  ;;  %54 = vmatpush.msra.mxu0 %v53_v1  ;;  %v51_v3 = vld [vmem:[#allocation2 + $0x68] sm:$0xff]  ;;  %v50_v4 = vld [vmem:[#allocation2 + $0x60] sm:$0xff]  ;;  %v49_v6 = vld [vmem:[#allocation2 + $0x58] sm:$0xff]  ;;  %s104_s6 = sshll.u32 %s180_s30, 4  ;;  %s106_s9 = sshll.u32 %s234_s5, 4  ;;  %s105_s6 = int_to_ptr.vmem [resolvable:$true] %s104_s6  ;;  %s107_s9 = int_to_ptr.hbm [resolvable:$true] %s106_s9 }
   0x8   :  { %v74_v5 = vld [vmem:[%s231_s2] sm:$0xff]  ;;  %v48_v7 = vld [vmem:[#allocation2 + $0x50] sm:$0xff]  ;;  %v47_v8 = vld [vmem:[#allocation2 + $0x48] sm:$0xff]  ;;  %v91_v25 = vand.u32 127, %v90_v21 }
   0x9   :  { %55 = vmatpush.msra.mxu0 %v52_v2  ;;  %77 = vperm.xlu0 %122, %v74_v5   ;;  %v86_v9 = vld [vmem:[%s233_s4] sm:$0xff]  ;;  %v45_v11 = vld [vmem:[#allocation2 + $0x38] sm:$0xff]  ;;  %v44_v12 = vld [vmem:[#allocation2 + $0x30] sm:$0xff] }
   0xa   :  { %v46_v10 = vld [vmem:[#allocation2 + $0x40] sm:$0xff]  ;;  %v43_v13 = vld [vmem:[#allocation2 + $0x28] sm:$0xff]  ;;  %v41_v15 = vld [vmem:[#allocation2 + $0x18] sm:$0xff] }
   0xb   :  { %56 = vmatpush.msra.mxu0 %v51_v3  ;;  %v42_v14 = vld [vmem:[#allocation2 + $0x20] sm:$0xff]  ;;  %v40_v16 = vld [vmem:[#allocation2 + $0x10] sm:$0xff]  ;;  %v39_v17 = vld [vmem:[#allocation2 + $0x8] sm:$0xff] }
   0xc   :  { %v38_v18 = vld [vmem:[#allocation2] sm:$0xff] }
   0xd   :  { %57 = vmatpush.msra.mxu0 %v50_v4  ;;  %v37_v19 = vld [vmem:[%s229_s0] sm:$0xff] }
   0xe   :  { %v123_v22 = vld [vmem:[%s232_s3] ss:$0 sm:$0xff] }
   0xf   :  { %58 = vmatpush.msra.mxu0 %v49_v6 }
  0x11   :  { %59 = vmatpush.msra.mxu0 %v48_v7  ;;  %93 = vperm.xlu0 %122, %v86_v9  }
  0x13   :  { %60 = vmatpush.msra.mxu0 %v47_v8 }
  0x15   :  { %61 = vmatpush.msra.mxu0 %v46_v10 }
  0x17   :  { %62 = vmatpush.msra.mxu0 %v45_v11 }
  0x19   :  { %63 = vmatpush.msra.mxu0 %v44_v12 }
  0x1b   :  { %64 = vmatpush.msra.mxu0 %v43_v13 }
  0x1d   :  { %65 = vmatpush.msra.mxu0 %v42_v14 }
  0x1f   :  { %66 = vmatpush.msra.mxu0 %v41_v15 }
  0x21   :  { %67 = vmatpush.msra.mxu0 %v40_v16 }
  0x23   :  { %68 = vmatpush.msra.mxu0 %v39_v17 }
  0x25   :  { %69 = vmatpush.msra.mxu0 %v38_v18 }
  0x26   :  { %70 = vmatmul.f32.vlgmr.msra.gmra.mxu0 %v37_v19 }
  0x7b   :  { %v78_v20 = vpop.permute.xlu0 %77 }
  0x83   :  { %v94_v26 = vpop.permute.xlu0 %93 }
  0x84   :  { %vm95_vm0 = vcmp.eq.s32.totalorder %v91_v25, %v94_v26 }
  0xa3   :  { %v71_v23 = vpop.f32.mrf.mxu0 }
  0xa4   :  { %v80_v24 = vmul.f32 %v78_v20, %v71_v23 }
  0xa6   :  { %v85_v27 = vmul.f32 %v123_v22, %v80_v24 }
  0xa8   :  { %v116_v28 = vadd.f32 -10.5, %v85_v27 }
  0xaa   :  { %v97_v29 = vsel %vm95_vm0, %v116_v28, %v85_v27 }
  0xab   :  { %98 = vst [vmem:[#allocation5] sm:$0xff] %v97_v29 }
  0xac   :  { %109 = dma.vmem_to_hbm [thread:$0]  %s105_s6, 128, %s107_s9, [#allocation4]  }
  0xad   :  { %174 = dma.done.wait [#allocation4], 128  }
  0xae   :  { %175 = vsyncadd [#allocation4], 4294967168 }
  0xaf   :  { %114 = vsyncpa [#allocation3], 1 }
  0xb0   :  { %115 = vsyncpa [#allocation4], 1 }

</bundles_post_ra>
